<compile_context>
chip_gen: v7x
topology: tpu7x:2x2x1
jax: 0.10.0
libtpu: 0.0.40
codegen_flags: <defaults>
</compile_context>

<pallas_src>
import jax
import jax.numpy as jnp
from jax import lax
from jax.experimental import pallas as pl
from jax.experimental.pallas import tpu as pltpu


# Tile caps: 512 x 2048 int32 = 4 MiB per output tile, 8 MiB double-buffered.
_TN_MAX = 512    # row tile (sublane axis), multiple of 8
_TC_MAX = 2048   # class tile (lane axis), multiple of 128


def _round_up(x: int, m: int) -> int:
    return ((x + m - 1) // m) * m


def _one_hot_kernel(idx_ref, out_ref):
    # idx_ref: (TN, 1)  int32 in VMEM (same block for every class tile j)
    # out_ref: (TN, TC) one-hot tile in VMEM
    tn, tc = out_ref.shape
    # Global class index for this tile = local lane iota + tile offset.
    class_ids = lax.broadcasted_iota(jnp.int32, (tn, tc), 1) + pl.program_id(1) * tc
    idx = idx_ref[...]  # (TN, 1), broadcasts across the class (lane) axis
    out_ref[...] = (class_ids == idx).astype(out_ref.dtype)


def to_one_hot(x, num_classes: int, dtype=jnp.int32):
    """Pallas equivalent of ToOneHot.forward.

    Args:
      x: 1-D integer array of indices, shape (N,).
      num_classes: number of classes C.
      dtype: output dtype (default int32; int8/bfloat16 cut HBM writes 4x).

    Returns:
      Array of shape (1, N, C) — leading 1 mirrors `torch.LongTensor([x])`.
    """
    x = jnp.asarray(x, dtype=jnp.int32)
    n = int(x.shape[0])
    c = int(num_classes)

    # Pad N to a sublane-dense row-tile multiple, C to a lane-dense class-tile
    # multiple, so every output block is fully (8, 128)-aligned (unmasked vst).
    n_pad = _round_up(max(n, 1), 8)
    tn = n_pad if n_pad <= _TN_MAX else _TN_MAX
    n_pad = _round_up(n_pad, tn)

    c_pad = _round_up(max(c, 1), 128)
    tc = c_pad if c_pad <= _TC_MAX else _TC_MAX
    c_pad = _round_up(c_pad, tc)

    # Padded rows get index -1 -> all-zero rows (sliced off below anyway).
    idx2d = jnp.full((n_pad, 1), -1, dtype=jnp.int32)
    idx2d = idx2d.at[:n, 0].set(x)

    grid = (n_pad // tn, c_pad // tc)  # C is the inner (fastest) grid axis

    out = pl.pallas_call(
        _one_hot_kernel,
        out_shape=jax.ShapeDtypeStruct((n_pad, c_pad), dtype),
        grid_spec=pltpu.PrefetchScalarGridSpec(
            num_scalar_prefetch=0,
            grid=grid,
            in_specs=[
                # Index column: same block across all class tiles j -> stays
                # resident in VMEM, no re-fetch on the inner loop.
                pl.BlockSpec((tn, 1), lambda i, j: (i, 0)),
            ],
            out_specs=pl.BlockSpec((tn, tc), lambda i, j: (i, j)),
        ),
        compiler_params=pltpu.CompilerParams(
            dimension_semantics=("parallel", "parallel"),
            vmem_limit_bytes=32 << 20,  # safe on v7x (64 MiB VMEM), ample on v5e/v6e
        ),
    )(idx2d)

    # Strip padding; `[x]` in the PyTorch module adds a leading dim of size 1.
    return out[:n, :c][None, ...]


if __name__ == "__main__":
    # Small shapes that still exercise padding (N not multiple of 8, C not
    # multiple of 128) and the pad/slice path.
    num_classes = 200
    n = 10

    key = jax.random.PRNGKey(0)
    x = jax.random.randint(key, (n,), minval=0, maxval=num_classes, dtype=jnp.int32)

    y = to_one_hot(x, num_classes)
    y = jax.block_until_ready(y)

    # reference check in plain JAX
    ref = jax.nn.one_hot(x, num_classes, dtype=jnp.int32)[None, ...]
    assert y.shape == (1, n, num_classes), y.shape
    assert y.dtype == jnp.int32
    assert bool(jnp.all(y == ref))
    assert bool(jnp.all(y.sum(axis=-1) == 1))

    # also sanity-check a lane/sublane-aligned case
    y2 = jax.block_until_ready(to_one_hot(x[:8], 128))
    ref2 = jax.nn.one_hot(x[:8] % 128, 128, dtype=jnp.int32)[None, ...]
    assert bool(jnp.all(y2 == jax.nn.one_hot(x[:8], 128, dtype=jnp.int32)[None, ...]))

    print("KERNEL_OK")
</pallas_src>

<mosaic_0001>
module attributes {stable_mosaic.version = 11 : i64} {
  func.func @_one_hot_kernel(%arg0: i32, %arg1: i32, %arg2: memref<16x1xi32, #tpu.memory_space<vmem>>, %arg3: memref<16x256xi32, #tpu.memory_space<vmem>>) attributes {dimension_semantics = [#tpu.dimension_semantics<parallel>, #tpu.dimension_semantics<parallel>], iteration_bounds = array<i64: 1, 1>, scalar_prefetch = 0 : i64, scratch_operands = 0 : i64, tpu.core_type = #tpu.core_type<tc>, window_params = [{transform_indices = @transform_0, window_bounds = array<i64: 16, 1>}, {transform_indices = @transform_1, window_bounds = array<i64: 16, 256>}]} {
    %0 = tpu.iota {dimensions = array<i32: 1>} : vector<16x256xi32>
    %c256_i32 = arith.constant 256 : i32
    %1 = arith.muli %arg1, %c256_i32 : i32
    %2 = vector.broadcast %1 : i32 to vector<16x256xi32>
    %3 = arith.addi %0, %2 : vector<16x256xi32>
    %c0 = arith.constant 0 : index
    %c0_0 = arith.constant 0 : index
    %4 = vector.load %arg2[%c0, %c0_0] : memref<16x1xi32, #tpu.memory_space<vmem>>, vector<16x1xi32>
    %5 = vector.broadcast %4 : vector<16x1xi32> to vector<16x256xi32>
    %6 = arith.cmpi eq, %3, %5 : vector<16x256xi32>
    %7 = arith.extui %6 : vector<16x256xi1> to vector<16x256xi32>
    %c0_1 = arith.constant 0 : index
    %c0_2 = arith.constant 0 : index
    %8 = vector.load %arg3[%c0_1, %c0_2] : memref<16x256xi32, #tpu.memory_space<vmem>>, vector<16x256xi32>
    tpu.vector_store %arg3[%c0_1, %c0_2], %7 {strides = array<i32>} : memref<16x256xi32, #tpu.memory_space<vmem>>, vector<16x256xi32>,
    return
  }
  func.func @transform_0(%arg0: i32, %arg1: i32) -> (i32, i32) {
    %c0_i32 = arith.constant 0 : i32
    %c0_i32_0 = arith.constant 0 : i32
    return %arg0, %c0_i32 : i32, i32
  }
  func.func @transform_1(%arg0: i32, %arg1: i32) -> (i32, i32) {
    %c0_i32 = arith.constant 0 : i32
    return %arg0, %arg1 : i32, i32
  }
}

</mosaic_0001>

<bundles_post_ra>
// kernel: tpu_custom_call.1
= control target key start
LH: loop header
LB: loop body
LE: loop exit
PB: predicated region body
PF: predicated region fallthrough
CT: control target
= control target key end

     0   :  { %s113_s0 = inlined_call_operand.vmem [shape: s32[16,1], index: 0, kind: input, shape index: {}]   ;;  %s114_s1 = inlined_call_operand.hbm [shape: s32[16,256], index: 1, kind: output, shape index: {}]  }
   0x1   :  { %v16_v0 = vld [vmem:[%s113_s0] sm:$0xff] }
   0x2   :  { %6 = vsyncpa [#allocation3], 0  ;;  %v81_v1 = vmov 0   ;;  %v17_v2 = vld [vmem:[%s113_s0 + $0x8] sm:$0xff]  ;;  %v9_v3 = vlaneseq  ;;  %s82_s10 = smov [#allocation2]  }
   0x3   :  { %56 = vset.pattern.permute.xlu0 %v81_v1  ;;  %s41_s11 = sshll.u32 %s82_s10, 4  ;;  %s42_s11 = int_to_ptr.vmem [resolvable:$true] %s41_s11 }
   0x4   :  { %19 = vperm.xlu0 %56, %v16_v0   ;;  %v10_v4 = vand.u32 127, %v9_v3  ;;  %s57_s0 = scalar_lea.vmem %s42_s11, 512  ;;  %p62_p1 = scmp.lt.s32.totalorder %s42_s11, %s42_s11 }
   0x5   :  { %p58_p0 = scmp.ne.s32.totalorder %s42_s11, %s57_s0  ;;  %p63_p2 = scmp.lt.s32.totalorder %s57_s0, %s57_s0 }
   0x6   :  { %v11_v5 = vadd.s32 128, %v10_v4 }
   0x7   :  { %p64_p3 = por %p63_p2, %p62_p1 }
   0x8   :  { %22 = vperm.xlu0 %56, %v17_v2  }
   0x9   :  { %p65_p4 = pnand %p64_p3, %p58_p0 }
  0x83   :  { %v20_v6 = vpop.permute.xlu0 %19 }
  0x84   :  { %vm24_vm0 = vcmp.eq.s32.totalorder %v10_v4, %v20_v6  ;;  %vm25_vm1 = vcmp.eq.s32.totalorder %v11_v5, %v20_v6 }
  0x85   :  { %v28_v7 = vsel %vm24_vm0, 1, %v81_v1  ;;  %v29_v8 = vsel %vm25_vm1, 1, %v81_v1 }
  0x86   :  { %32 = vst [vmem:[#allocation2] sm:$0xff] %v28_v7  ;;  %33 = vst [vmem:[#allocation2 + $0x8] sm:$0xff] %v29_v8 }
  0x87   :  { %v23_v9 = vpop.permute.xlu0 %22 }
  0x88   :  { %vm26_vm2 = vcmp.eq.s32.totalorder %v10_v4, %v23_v9  ;;  %vm27_vm3 = vcmp.eq.s32.totalorder %v11_v5, %v23_v9 }
  0x89   :  { %v30_v10 = vsel %vm26_vm2, 1, %v81_v1  ;;  %v31_v11 = vsel %vm27_vm3, 1, %v81_v1 }
  0x8a   :  { %34 = vst [vmem:[#allocation2 + $0x10] sm:$0xff] %v30_v10  ;;  %35 = vst [vmem:[#allocation2 + $0x18] sm:$0xff] %v31_v11 }
  0x8b   :  { %68 = shalt.err (!%p65_p4)
}
  0x8c   :  { %s69_s14 = scalar_lea.hbm %s114_s1, 512 }
  0x8d   :  { %p70_p5 = scmp.ne.s32.totalorder %s114_s1, %s69_s14  ;;  %p73_p6 = scmp.lt.u32.totalorder %s69_s14, %s114_s1 }
  0x8f   :  { %p75_p7 = pnand %p73_p6, %p70_p5 }
  0x91   :  { %78 = shalt.err (!%p75_p7)
}
  0x92   :  { %s83_s19 = smov 256   ;;  %s84_s20 = smov 16  }
  0x93   :  { %47 = dma.vmem_to_hbm [thread:$0]  %s42_s11, 512, %s114_s1, [#allocation3], %s83_s19, %s83_s19, %s84_s20  }
  0x94   :  { %79 = dma.done.wait [#allocation3], 512  }
  0x95   :  { %80 = vsyncadd [#allocation3], 4294966784 }
  0x96   :  { %51 = vsyncpa [#allocation3], 1 }

</bundles_post_ra>
